<compile_context>
chip_gen: v7x
topology: tpu7x:2x2x1
jax: 0.10.0
libtpu: 0.0.40
codegen_flags: <defaults>
</compile_context>

<pallas_src>
import numpy as np
import jax
import jax.numpy as jnp
from jax.experimental import pallas as pl
from jax.experimental.pallas import tpu as pltpu


def get_pos_enc_table(embd_dim: int, positions: int = 150) -> jnp.ndarray:
    """Sinusoidal positional-encoding buffer, shape (1, positions, embd_dim)."""
    pos = np.arange(positions, dtype=np.float64)[:, None]          # (P, 1)
    i = np.arange(embd_dim, dtype=np.float64)[None, :]             # (1, D)
    angles = pos / np.power(10000.0, (2.0 * (i // 2)) / embd_dim)  # (P, D)
    angles[:, 0::2] = np.sin(angles[:, 0::2])
    angles[:, 1::2] = np.cos(angles[:, 1::2])
    return jnp.asarray(angles[None, :, :], dtype=jnp.float32)      # (1, P, D)


def _add_pos_kernel(x_ref, pe_ref, o_ref):
    # x_ref / pe_ref / o_ref: (TS, C) VMEM tiles (leading batch dim squeezed).
    o_ref[...] = x_ref[...] + pe_ref[...]


def _choose_row_tile(rows: int, cols: int, itemsize: int,
                     tile_bytes: int = 2 * 1024 * 1024) -> int:
    """Largest row tile (multiple of 8, or full extent) whose double-buffered
    working set (~6 tiles) stays well under the scoped-VMEM default on every
    TPU generation (v5e 16 MiB ... v6e/v7x 32 MiB)."""
    max_rows = max(tile_bytes // max(cols * itemsize, 1), 1)
    if rows <= max_rows or rows < 8:
        return rows                          # whole extent fits in one tile
    return max((min(rows, max_rows) // 8) * 8, 8)


def _pos_enc_forward(inp_seq: jnp.ndarray, pe_table: jnp.ndarray) -> jnp.ndarray:
    """inp_seq: (B, S, D);  pe_table: (1, P, D) with P >= S."""
    B, S, D = inp_seq.shape
    P = pe_table.shape[1]
    if S > P:
        # Same failure mode as the PyTorch module (table only has P positions).
        raise ValueError(f"sequence length {S} exceeds positional table size {P}")

    pe_slice = pe_table[:, :S, :].astype(inp_seq.dtype)   # (1, S, D) glue slice

    # Lane-dense layout: re-chunk (S, D) into 128-wide lanes when possible so
    # the store path is full-width vst (no masked vst.msk for D < 128).
    if (S * D) % 128 == 0:
        R, C = (S * D) // 128, 128
    else:
        R, C = S, D                                        # fallback layout

    x3 = inp_seq.reshape(B, R, C)
    pe3 = pe_slice.reshape(1, R, C)

    TS = _choose_row_tile(R, C, inp_seq.dtype.itemsize)
    n_row_tiles = pl.cdiv(R, TS)

    blk = (pl.Squeezed(), TS, C)   # kernel sees clean 2D (TS, C) refs

    out = pl.pallas_call(
        _add_pos_kernel,
        out_shape=jax.ShapeDtypeStruct((B, R, C), inp_seq.dtype),
        grid_spec=pltpu.PrefetchScalarGridSpec(
            num_scalar_prefetch=0,
            # Batch innermost: PE block index is constant across consecutive
            # steps -> Pallas keeps the PE tile resident (no re-DMA per batch).
            grid=(n_row_tiles, B),
            in_specs=[
                pl.BlockSpec(blk, lambda t, b: (b, t, 0)),   # per-batch x tile
                pl.BlockSpec(blk, lambda t, b: (0, t, 0)),   # broadcast PE tile
            ],
            out_specs=pl.BlockSpec(blk, lambda t, b: (b, t, 0)),
        ),
        compiler_params=pltpu.CompilerParams(
            dimension_semantics=("parallel", "parallel"),
        ),
        # In-place add (mirrors PyTorch `inp_seq += ...`).
        input_output_aliases={0: 0},
    )(x3, pe3)

    return out.reshape(B, S, D)


pos_enc_forward = jax.jit(_pos_enc_forward)


if __name__ == "__main__":
    B, S, D = 2, 8, 32
    POSITIONS = 150

    key = jax.random.PRNGKey(0)
    x = jax.random.normal(key, (B, S, D), dtype=jnp.float32)

    pe_table = get_pos_enc_table(D, POSITIONS)

    # Reference computed up-front (pure numpy, mirrors the PyTorch forward).
    ref = np.asarray(x) + np.asarray(pe_table[:, :S, :])

    out = pos_enc_forward(x, pe_table)
    out = jax.block_until_ready(out)

    np.testing.assert_allclose(np.asarray(out), ref, rtol=1e-6, atol=1e-6)

    print("KERNEL_OK")
</pallas_src>

<mosaic_0001>
module attributes {stable_mosaic.version = 11 : i64} {
  func.func @_add_pos_kernel(%arg0: i32, %arg1: i32, %arg2: memref<1x2x128xf32, #tpu.memory_space<vmem>>, %arg3: memref<1x2x128xf32, #tpu.memory_space<vmem>>, %arg4: memref<1x2x128xf32, #tpu.memory_space<vmem>>) attributes {dimension_semantics = [#tpu.dimension_semantics<parallel>, #tpu.dimension_semantics<parallel>], iteration_bounds = array<i64: 1, 2>, scalar_prefetch = 0 : i64, scratch_operands = 0 : i64, tpu.core_type = #tpu.core_type<tc>, window_params = [{transform_indices = @transform_0, window_bounds = array<i64: 1, 2, 128>}, {transform_indices = @transform_1, window_bounds = array<i64: 1, 2, 128>}, {transform_indices = @transform_2, window_bounds = array<i64: 1, 2, 128>}]} {
    %c0 = arith.constant 0 : index
    %c0_0 = arith.constant 0 : index
    %c0_1 = arith.constant 0 : index
    %0 = vector.load %arg2[%c0, %c0_0, %c0_1] : memref<1x2x128xf32, #tpu.memory_space<vmem>>, vector<1x2x128xf32>
    %1 = vector.shape_cast %0 : vector<1x2x128xf32> to vector<2x128xf32>
    %c0_2 = arith.constant 0 : index
    %c0_3 = arith.constant 0 : index
    %c0_4 = arith.constant 0 : index
    %2 = vector.load %arg3[%c0_2, %c0_3, %c0_4] : memref<1x2x128xf32, #tpu.memory_space<vmem>>, vector<1x2x128xf32>
    %3 = vector.shape_cast %2 : vector<1x2x128xf32> to vector<2x128xf32>
    %4 = arith.addf %1, %3 : vector<2x128xf32>
    %c0_5 = arith.constant 0 : index
    %c0_6 = arith.constant 0 : index
    %c0_7 = arith.constant 0 : index
    %5 = vector.load %arg4[%c0_5, %c0_6, %c0_7] : memref<1x2x128xf32, #tpu.memory_space<vmem>>, vector<1x2x128xf32>
    %6 = vector.shape_cast %5 : vector<1x2x128xf32> to vector<2x128xf32>
    %7 = vector.shape_cast %4 : vector<2x128xf32> to vector<1x2x128xf32>
    tpu.vector_store %arg4[%c0_5, %c0_6, %c0_7], %7 {strides = array<i32>} : memref<1x2x128xf32, #tpu.memory_space<vmem>>, vector<1x2x128xf32>,
    return
  }
  func.func @transform_0(%arg0: i32, %arg1: i32) -> (i32, i32, i32) {
    %c0_i32 = arith.constant 0 : i32
    %c0_i32_0 = arith.constant 0 : i32
    return %arg1, %arg0, %c0_i32 : i32, i32, i32
  }
  func.func @transform_1(%arg0: i32, %arg1: i32) -> (i32, i32, i32) {
    %c0_i32 = arith.constant 0 : i32
    %c0_i32_0 = arith.constant 0 : i32
    %c0_i32_1 = arith.constant 0 : i32
    return %c0_i32, %arg0, %c0_i32_0 : i32, i32, i32
  }
  func.func @transform_2(%arg0: i32, %arg1: i32) -> (i32, i32, i32) {
    %c0_i32 = arith.constant 0 : i32
    %c0_i32_0 = arith.constant 0 : i32
    return %arg1, %arg0, %c0_i32 : i32, i32, i32
  }
}

</mosaic_0001>

<bundles_post_ra>
// kernel: _pos_enc_forward.1
= control target key start
LH: loop header
LB: loop body
LE: loop exit
PB: predicated region body
PF: predicated region fallthrough
CT: control target
= control target key end

     0   :  { %s354_s9 = smov 0   ;;  %s331_s10 = smov 0   ;;  %s368_s0 = inlined_call_operand.vmem [shape: f32[2,2,128], index: 0, kind: input, shape index: {}, may-alias: {0,2}]   ;;  %s369_s1 = inlined_call_operand.vmem [shape: f32[1,2,128], index: 1, kind: input, shape index: {}]   ;;  %s370_s2 = inlined_call_operand.vmem [shape: f32[2,2,128], index: 2, kind: output, shape index: {}, may-alias: {0,2}]  }
   0x1   :  { %s335_s11 = smov 0  }
   0x2 LB: > { %s21_s12 = sadd.s32 1, %s333_s10  ;;  %p286_p0 = scmp.ge.s32.totalorder %s337_s11, 1  ;;  %s337_s11 = sphi %s335_s11, %s12_s11   ;;  %s333_s10 = sphi %s331_s10, %s332_s10   ;;  %s329_s9 = sphi %s354_s9, %s371_s9  }
   0x3   : > { %p22_p1 = scmp.ge.s32.totalorder %s21_s12, 2  ;;  %p139_p2 = scmp.lt.s32.totalorder %s337_s11, 3 }
   0x5   : > { %s373_s12 = smov (%p22_p1, %s21_s12), 0  ;;  %p140_p3 = pnand %p286_p0, %p139_p2 }
   0x6   : > { %p169_p4 = scmp.lt.s32.totalorder (!%p140_p3), %s329_s9, 1  ;;  %v188_v0 = vld [vmem:[%s369_s1] sm:$0x3] (!%p140_p3) }
   0x7   : > { %143 = sbr.rel (%p140_p3) target bundleno = 21 (0x15), region = 28 }
   0xe   : > { %s375_s9 = smov (!%p169_p4, %s329_s9), 1 }
   0xf   : > { %s287_s13 = sshll.u32 %s375_s9, 1 }
  0x10   : > { %s175_s18 = scalar_lea.vmem %s368_s0, %s287_s13  ;;  %s186_s21 = scalar_lea.vmem %s370_s2, %s287_s13 }
  0x11   : > { %v187_v1 = vld [vmem:[%s175_s18] sm:$0x3] }
  0x12   : > { %v189_v2 = vadd.f32 %v188_v0, %v187_v1 }
  0x14   : > { %190 = vst [vmem:[%s186_s21] sm:$0x3] %v189_v2 }
  0x15 PF: > { %s12_s11 = sadd.s32 1, %s337_s11   ;;  %s371_s9 = smov %s333_s10 }
  0x16   : > { %p9_p5 = scmp.ge.s32.totalorder %s12_s11, 4   ;;  %s332_s10 = smov %s373_s12  }
  0x18   :  { %11 = sbr.rel (!%p9_p5) target bundleno = 2 (0x2), region = 61 }

</bundles_post_ra>
